<compile_context>
chip_gen: v5e
topology: v5e:2x2
jax: 0.10.0
libtpu: 0.0.40
codegen_flags: <defaults>
</compile_context>

<pallas_src>
import functools

import jax
import jax.numpy as jnp
from jax.experimental import pallas as pl
from jax.experimental.pallas import tpu as pltpu


# -----------------------------------------------------------------------------
# Small setup helpers
# -----------------------------------------------------------------------------
def _round_up(n, m):
    return (n + m - 1) // m * m


def _weight_norm(v, g):
    """weight_norm: w = g * v / ||v||_2, norm over (Cin, KH, KW) per out-channel."""
    norm = jnp.sqrt(jnp.sum(v * v, axis=(1, 2, 3), keepdims=True))
    return g * v / norm


@functools.lru_cache(maxsize=None)
def _roll_backward_shift_sign() -> int:
    """Determine pltpu.roll's rotation convention once (cached).

    Returns +1 if pltpu.roll matches np.roll (out[i] = x[(i - shift) % N]), -1 if
    it rotates the other way.  The 3x3 conv tap shifts are built from this sign so
    the stencil indexing is correct regardless of convention / jax version.
    """
    def probe(x_ref, o_ref):
        o_ref[...] = pltpu.roll(x_ref[...], 1, axis=1)

    x = jnp.tile(jnp.arange(128, dtype=jnp.float32)[None, :], (8, 1))
    y = pl.pallas_call(
        probe, out_shape=jax.ShapeDtypeStruct((8, 128), jnp.float32)
    )(x)
    return 1 if float(y[0, 64]) == 63.0 else -1


# -----------------------------------------------------------------------------
# The fused ResnetBlock kernel
# -----------------------------------------------------------------------------
def _resnet_block_kernel(x_ref, bn_ref, b_ref, w1_ref, w2_ref, w3_ref, o_ref,
                         *, H, W, M, roll_sign, eps):
    """One fused pass of:  x + (BN -> 1x1 -> ReLU -> BN -> 3x3 -> ReLU -> BN -> 1x1)(x).

    Layouts:
      x_ref, o_ref : (C, M_pad) f32   -- channels on sublanes, B*H*W lane-dense.
      bn_ref       : (3, 2, C, 1) f32 -- [bn_idx, gamma/beta, channel, 1].
      b_ref        : (3, C, 1) f32    -- conv biases.
      w1_ref,w3_ref: (C, C) bf16      -- (Cout, Cin) for the 1x1 convs.
      w2_ref       : (3, 3, C, C) bf16-- (kh, kw, Cout, Cin) taps of the 3x3 conv.
    """
    C, M_pad = x_ref.shape
    f32 = jnp.float32
    x = x_ref[...]                                      # (C, M_pad) f32

    padded = M_pad != M
    inv_n = 1.0 / float(M)
    if padded:
        lane_ok = jax.lax.broadcasted_iota(jnp.int32, (1, M_pad), 1) < M

    def batch_norm(a, k):
        # Training-mode BatchNorm2d: biased batch stats over (B, H, W) == lane axis.
        if padded:
            am = jnp.where(lane_ok, a, 0.0)
            mean = jnp.sum(am, axis=1, keepdims=True) * inv_n
            d = jnp.where(lane_ok, a - mean, 0.0)
            var = jnp.sum(d * d, axis=1, keepdims=True) * inv_n
        else:
            mean = jnp.mean(a, axis=1, keepdims=True)
            d = a - mean
            var = jnp.mean(d * d, axis=1, keepdims=True)
        gamma = bn_ref[k, 0]                            # (C, 1)
        beta = bn_ref[k, 1]                             # (C, 1)
        return (a - mean) * (jax.lax.rsqrt(var + eps) * gamma) + beta

    def conv1x1(a, w_ref_, k):
        # (Cout, Cin) @ (Cin, M): lane-dense output; bf16 MXU operands, f32 acc.
        return jnp.dot(w_ref_[...], a.astype(jnp.bfloat16),
                       preferred_element_type=f32) + b_ref[k]

    # ---- BN1 -> 1x1 conv -> ReLU -------------------------------------------
    h = batch_norm(x, 0)
    h = jnp.maximum(conv1x1(h, w1_ref, 0), 0.0)

    # ---- BN2 -> 3x3 conv (padding=1) -> ReLU --------------------------------
    h = batch_norm(h, 1)
    pos = jax.lax.broadcasted_iota(jnp.int32, (1, M_pad), 1)
    col = pos % W
    row = (pos // W) % H
    acc = jnp.zeros((C, M_pad), f32)
    for kh in range(3):
        dh = kh - 1
        row_ok = jnp.logical_and(row + dh >= 0, row + dh < H)
        for kw in range(3):
            dw = kw - 1
            ok = jnp.logical_and(row_ok,
                                 jnp.logical_and(col + dw >= 0, col + dw < W))
            off = dh * W + dw                            # flat lane offset of this tap
            if off == 0:
                shifted = h
            else:
                # shifted[c, m] == h[c, m + off] (wrap-around lanes are masked off).
                shifted = pltpu.roll(h, (roll_sign * (-off)) % M_pad, axis=1)
            tap = jnp.where(ok, shifted, 0.0).astype(jnp.bfloat16)
            acc = acc + jnp.dot(w2_ref[kh, kw], tap, preferred_element_type=f32)
    h = jnp.maximum(acc + b_ref[1], 0.0)

    # ---- BN3 -> 1x1 conv -> residual add ------------------------------------
    h = batch_norm(h, 2)
    h = conv1x1(h, w3_ref, 2)
    o_ref[...] = x + h


def resnet_block(x_nchw, params, *, eps=1e-5):
    """Fused Pallas forward of ResnetBlock.  x_nchw: (B, n_filters, H, W) float32."""
    B, C, H, W = x_nchw.shape
    M = B * H * W
    M_pad = _round_up(M, 128)

    # Single-step, fully VMEM-resident kernel: check the budget (per-copy ~C*M*4 B).
    assert C * M_pad * 4 * 12 < (24 << 20), (
        "activation too large for the fused single-step kernel; "
        "TODO(synk): tile over M with a parallel grid for this size")

    # NCHW -> (C, B*H*W): channels on sublanes, spatial*batch lane-dense.
    x_cm = jnp.transpose(x_nchw.astype(jnp.float32), (1, 0, 2, 3)).reshape(C, M)
    if M_pad != M:
        x_cm = jnp.pad(x_cm, ((0, 0), (0, M_pad - M)))

    # Pack per-channel BN params and conv biases as (.., C, 1) f32 columns.
    bn = jnp.stack([
        jnp.stack([params["bn1"]["gamma"], params["bn1"]["beta"]]),
        jnp.stack([params["bn2"]["gamma"], params["bn2"]["beta"]]),
        jnp.stack([params["bn3"]["gamma"], params["bn3"]["beta"]]),
    ]).astype(jnp.float32)[..., None]                    # (3, 2, C, 1)
    bias = jnp.stack([params["conv1"]["b"], params["conv2"]["b"],
                      params["conv3"]["b"]]).astype(jnp.float32)[..., None]  # (3, C, 1)

    # weight_norm'ed conv weights; bf16 operands for the MXU (f32 accumulation).
    w1 = _weight_norm(params["conv1"]["v"], params["conv1"]["g"]).reshape(C, C)
    w3 = _weight_norm(params["conv3"]["v"], params["conv3"]["g"]).reshape(C, C)
    w2 = jnp.transpose(_weight_norm(params["conv2"]["v"], params["conv2"]["g"]),
                       (2, 3, 0, 1))                     # (KH, KW, Cout, Cin)
    w1, w2, w3 = (w.astype(jnp.bfloat16) for w in (w1, w2, w3))

    kernel = functools.partial(_resnet_block_kernel, H=H, W=W, M=M,
                               roll_sign=_roll_backward_shift_sign(), eps=eps)
    vmem = pl.BlockSpec(memory_space=pltpu.MemorySpace.VMEM)
    out_cm = pl.pallas_call(
        kernel,
        out_shape=jax.ShapeDtypeStruct((C, M_pad), jnp.float32),
        in_specs=[vmem] * 6,
        out_specs=vmem,
        compiler_params=pltpu.CompilerParams(vmem_limit_bytes=32 * 1024 * 1024),
    )(x_cm, bn, bias, w1, w2, w3)

    out = out_cm[:, :M].reshape(C, B, H, W)
    return jnp.transpose(out, (1, 0, 2, 3))              # back to NCHW


# -----------------------------------------------------------------------------
# Parameter init (weight-norm parameterization, PyTorch-style fresh module)
# -----------------------------------------------------------------------------
def init_resnet_block(key, n_filters):
    def wn_conv(k, cin, cout, ks):
        kv, kb = jax.random.split(k)
        fan_in = cin * ks * ks
        v = jax.random.normal(kv, (cout, cin, ks, ks), jnp.float32) / jnp.sqrt(fan_in)
        g = jnp.sqrt(jnp.sum(v * v, axis=(1, 2, 3), keepdims=True))   # weight_norm init: w == v
        b = 0.1 * jax.random.normal(kb, (cout,), jnp.float32)
        return {"v": v, "g": g, "b": b}

    def bn(c):
        return {"gamma": jnp.ones((c,), jnp.float32), "beta": jnp.zeros((c,), jnp.float32)}

    k1, k2, k3 = jax.random.split(key, 3)
    C = n_filters
    return {"bn1": bn(C), "conv1": wn_conv(k1, C, C, 1),
            "bn2": bn(C), "conv2": wn_conv(k2, C, C, 3),
            "bn3": bn(C), "conv3": wn_conv(k3, C, C, 1)}


# -----------------------------------------------------------------------------
# Pure-JAX reference (f32) for a numerical cross-check
# -----------------------------------------------------------------------------
def resnet_block_reference(x, params, *, eps=1e-5):
    def bn(a, p):
        mean = jnp.mean(a, axis=(0, 2, 3), keepdims=True)
        var = jnp.var(a, axis=(0, 2, 3), keepdims=True)
        g = p["gamma"].reshape(1, -1, 1, 1)
        b = p["beta"].reshape(1, -1, 1, 1)
        return (a - mean) * jax.lax.rsqrt(var + eps) * g + b

    def conv(a, p, pad):
        w = _weight_norm(p["v"], p["g"])
        out = jax.lax.conv_general_dilated(
            a, w, window_strides=(1, 1), padding=[(pad, pad), (pad, pad)],
            dimension_numbers=("NCHW", "OIHW", "NCHW"),
            precision=jax.lax.Precision.HIGHEST)
        return out + p["b"].reshape(1, -1, 1, 1)

    h = bn(x, params["bn1"]); h = jax.nn.relu(conv(h, params["conv1"], 0))
    h = bn(h, params["bn2"]); h = jax.nn.relu(conv(h, params["conv2"], 1))
    h = bn(h, params["bn3"]); h = conv(h, params["conv3"], 0)
    return x + h


if __name__ == "__main__":
    key = jax.random.PRNGKey(0)
    kx, kp = jax.random.split(key)

    # ResnetBlock(n_filters=8) applied to a small NCHW batch.
    B, n_filters, H, W = 2, 8, 16, 16
    x = jax.random.normal(kx, (B, n_filters, H, W), jnp.float32)
    params = init_resnet_block(kp, n_filters)

    out = resnet_block(x, params)
    jax.block_until_ready(out)
    assert out.shape == (B, n_filters, H, W)

    ref = resnet_block_reference(x, params)
    ref_scale = float(jnp.max(jnp.abs(ref)))
    err = float(jnp.max(jnp.abs(out - ref)))
    assert err <= 2e-2 + 2e-2 * ref_scale, (
        f"kernel/reference mismatch: max abs err {err} (ref scale {ref_scale})")

    print("KERNEL_OK")
</pallas_src>

<mosaic_0001>
module attributes {stable_mosaic.version = 11 : i64} {
  func.func @probe(%arg0: memref<8x128xf32, #tpu.memory_space<vmem>>, %arg1: memref<8x128xf32, #tpu.memory_space<vmem>>) attributes {dimension_semantics = [], scalar_prefetch = 0 : i64, scratch_operands = 0 : i64, tpu.core_type = #tpu.core_type<tc>} {
    %c0 = arith.constant 0 : index
    %c0_0 = arith.constant 0 : index
    %0 = vector.load %arg0[%c0, %c0_0] : memref<8x128xf32, #tpu.memory_space<vmem>>, vector<8x128xf32>
    %c1_i32 = arith.constant 1 : i32
    %1 = tpu.dynamic_rotate %0 by %c1_i32 dim 1 : vector<8x128xf32>, i32 -> vector<8x128xf32>
    %c0_1 = arith.constant 0 : index
    %c0_2 = arith.constant 0 : index
    %2 = vector.load %arg1[%c0_1, %c0_2] : memref<8x128xf32, #tpu.memory_space<vmem>>, vector<8x128xf32>
    tpu.vector_store %arg1[%c0_1, %c0_2], %1 {strides = array<i32>} : memref<8x128xf32, #tpu.memory_space<vmem>>, vector<8x128xf32>,
    return
  }
}

</mosaic_0001>

<bundles_post_ra>
// kernel: tpu_custom_call.1
= control target key start
LH: loop header
LB: loop body
LE: loop exit
PB: predicated region body
PF: predicated region fallthrough
CT: control target
= control target key end

     0   :  { %6 = vsyncpa [#allocation3], 0  ;;  %s118_s0 = inlined_call_operand.hbm [shape: f32[8,128], index: 0, kind: input, shape index: {}]   ;;  %s119_s1 = inlined_call_operand.hbm [shape: f32[8,128], index: 1, kind: output, shape index: {}]  }
   0x1   :  { %7 = vsyncpa [#allocation4], 0  ;;  %s13_s8 = sshll.u32 %s118_s0, 4  ;;  %s99_s9 = smov [#allocation2]   ;;  %s14_s8 = int_to_ptr.hbm [resolvable:$true] %s13_s8 }
   0x2   :  { %s15_s10 = sshll.u32 %s99_s9, 4  ;;  %s16_s10 = int_to_ptr.vmem [resolvable:$true] %s15_s10 }
   0x3   :  { %18 = dma.hbm_to_vmem [thread:$0]  %s14_s8, 128, %s16_s10, [#allocation3]  }
   0x4   :  { %95 = dma.done.wait [#allocation3], 128  }
   0x5   :  { %96 = vsyncadd [#allocation3], 4294967168  ;;  %v23_v0 = vld [vmem:[#allocation2] sm:$0xff]  ;;  %s100_s11 = smov 1   ;;  %s101_s12 = smov [#allocation5]  }
   0x6   :  { %24 = vrot.lane.b32.xlu0 %v23_v0, %s100_s11  ;;  %s32_s13 = sshll.u32 %s101_s12, 4  ;;  %s34_s16 = sshll.u32 %s119_s1, 4  ;;  %s33_s13 = int_to_ptr.vmem [resolvable:$true] %s32_s13  ;;  %s35_s16 = int_to_ptr.hbm [resolvable:$true] %s34_s16 }
  0x78   :  { %v25_v1 = vpop.permute.xlu0 %24 }
  0x79   :  { %26 = vst [vmem:[#allocation5] sm:$0xff] %v25_v1 }
  0x7a   :  { %37 = dma.vmem_to_hbm [thread:$0]  %s33_s13, 128, %s35_s16, [#allocation4]  }
  0x7b   :  { %97 = dma.done.wait [#allocation4], 128  }
  0x7c   :  { %98 = vsyncadd [#allocation4], 4294967168 }
  0x7d   :  { %42 = vsyncpa [#allocation3], 1 }
  0x7e   :  { %43 = vsyncpa [#allocation4], 1 }

</bundles_post_ra>
